<compile_context>
chip_gen: v7x
topology: tpu7x:2x2x1
jax: 0.10.0
libtpu: 0.0.40
codegen_flags: <defaults>
</compile_context>

<pallas_src>
import math

import jax
import jax.numpy as jnp
from jax import lax
from jax.experimental import pallas as pl
from jax.experimental.pallas import tpu as pltpu

_LANE = 128
_MIB = 1024 * 1024

# ----------------------------------------------------------------------------
# db4 wavelet filters (pywt convention)
# ----------------------------------------------------------------------------
_DB4_DEC_LO = [
    -0.010597401784997278,
    0.032883011666982945,
    0.030841381835986965,
    -0.18703481171888114,
    -0.02798376941698385,
    0.6308807679295904,
    0.7148465705525415,
    0.23037781330885523,
]


def _wavelet_filters(dtype=jnp.float32):
    dec_lo = jnp.asarray(_DB4_DEC_LO, dtype)
    rec_lo = dec_lo[::-1]
    k = jnp.arange(dec_lo.shape[0])
    sign = jnp.where(k % 2 == 0, 1.0, -1.0).astype(dtype)
    dec_hi = -sign * rec_lo          # dec_hi[k] = (-1)^(k+1) * rec_lo[k]
    rec_hi = sign * dec_lo           # rec_hi[k] = (-1)^k     * dec_lo[k]
    return dec_lo, dec_hi, rec_lo, rec_hi


# ----------------------------------------------------------------------------
# Analysis / synthesis filter banks (pytorch_wavelets semantics, mode='symmetric'),
# channels-last (NHWC) grouped convolutions: all 8 taps fuse into one XLA conv
# and NHWC depthwise lowers much better on TPU than NCHW.
# ----------------------------------------------------------------------------
def _afb1d_nhwc(x, h0, h1, axis):
    """Single-level 1D analysis along spatial `axis` (1=H, 2=W) of an NHWC tensor."""
    C = x.shape[3]
    L = h0.shape[0]
    N = x.shape[axis]
    outsize = (N + L - 1) // 2                     # pywt.dwt_coeff_len (non-periodized)
    p = 2 * (outsize - 1) - N + L
    pad = [(0, 0)] * 4
    pad[axis] = (p // 2, (p + 1) // 2)
    xp = jnp.pad(x, pad, mode="symmetric")

    h0r, h1r = h0[::-1], h1[::-1]                  # conv = correlation with reversed filt
    if axis == 1:
        kshape, strides = (L, 1), (2, 1)
    else:
        kshape, strides = (1, L), (1, 2)
    # HWIO depthwise kernel; group c outputs channels [2c, 2c+1] = (lo_c, hi_c).
    k = jnp.stack([h0r, h1r], axis=-1).reshape(kshape[0], kshape[1], 1, 2)
    k = jnp.tile(k, (1, 1, 1, C))                  # (kh, kw, 1, 2C)
    y = lax.conv_general_dilated(
        xp, k, window_strides=strides, padding="VALID",
        dimension_numbers=("NHWC", "HWIO", "NHWC"),
        feature_group_count=C, precision=lax.Precision.HIGHEST)
    y = y.reshape(y.shape[0], y.shape[1], y.shape[2], C, 2)
    return y[..., 0], y[..., 1]                    # lo, hi (each NHWC)


def _sfb1d_nhwc(lo, hi, g0, g1, axis):
    """Single-level 1D synthesis along spatial `axis` (1=H, 2=W), NHWC."""
    C = lo.shape[3]
    L = g0.shape[0]
    g0r, g1r = g0[::-1], g1[::-1]
    # interleave lo/hi per channel: [lo_0, hi_0, lo_1, hi_1, ...]
    x2 = jnp.stack([lo, hi], axis=-1).reshape(lo.shape[0], lo.shape[1], lo.shape[2], 2 * C)
    if axis == 1:
        kshape, lhs_dil, pad = (L, 1), (2, 1), [(1, 1), (0, 0)]
    else:
        kshape, lhs_dil, pad = (1, L), (1, 2), [(0, 0), (1, 1)]
    k = jnp.stack([g0r, g1r], axis=-1).reshape(kshape[0], kshape[1], 2, 1)
    k = jnp.tile(k, (1, 1, 1, C))                  # (kh, kw, 2, C): group c sums lo*g0+hi*g1
    return lax.conv_general_dilated(
        x2, k, window_strides=(1, 1), padding=pad, lhs_dilation=lhs_dil,
        dimension_numbers=("NHWC", "HWIO", "NHWC"),
        feature_group_count=C, precision=lax.Precision.HIGHEST)


def dwt2d_nhwc(x, dec_lo, dec_hi, J):
    """J-level 2D DWT on an NHWC tensor.  Returns (yl, [yh_finest..yh_coarsest]),
    each yh of shape (B, h, w, C, 3) stacking (lh, hl, hh) on the last axis."""
    yh = []
    ll = x
    for _ in range(J):
        lo_w, hi_w = _afb1d_nhwc(ll, dec_lo, dec_hi, axis=2)   # along W
        llc, lh = _afb1d_nhwc(lo_w, dec_lo, dec_hi, axis=1)    # along H
        hl, hh = _afb1d_nhwc(hi_w, dec_lo, dec_hi, axis=1)
        yh.append(jnp.stack([lh, hl, hh], axis=-1))
        ll = llc
    return ll, yh


def idwt2d_nhwc(yl, yh, rec_lo, rec_hi):
    ll = yl
    for h in yh[::-1]:
        if ll.shape[1] > h.shape[1]:
            ll = ll[:, :-1, :, :]
        if ll.shape[2] > h.shape[2]:
            ll = ll[:, :, :-1, :]
        lh, hl, hh = h[..., 0], h[..., 1], h[..., 2]
        lo = _sfb1d_nhwc(ll, lh, rec_lo, rec_hi, axis=1)
        hi = _sfb1d_nhwc(hl, hh, rec_lo, rec_hi, axis=1)
        ll = _sfb1d_nhwc(lo, hi, rec_lo, rec_hi, axis=2)
    return ll


# ----------------------------------------------------------------------------
# Device / dtype / tiling helpers
# ----------------------------------------------------------------------------
def _tpu_kind():
    try:
        dev = jax.devices()[0]
        if dev.platform != "tpu":
            return ""
        return dev.device_kind.lower()
    except Exception:
        return ""


def _is_v7x():
    k = _tpu_kind()
    return ("v7" in k) or ("7x" in k)


def _mul2d_compute_dtype():
    """bf16 multiplies (f32 accumulation) on chips with a bf16 VPU; f32 on v5e and
    older.  Robust to device_kind spelling: any TPU that is NOT v2..v5 is treated
    as bf16-capable (covers 'TPU v6e', 'TPU v6 lite', 'TPU7x', 'TPU v7x', ...)."""
    kind = _tpu_kind()
    if not kind:
        return jnp.float32
    for old in ("v2", "v3", "v4", "v5"):
        if old in kind:
            return jnp.float32
    return jnp.bfloat16


def _sublane(dtype):
    return 16 if jnp.dtype(dtype) == jnp.dtype(jnp.bfloat16) else 8


def _round_up(a, b):
    return (a + b - 1) // b * b


def _spatial_rows(P, compute_dtype):
    """Number of 128-lane rows the flattened spatial axis is padded to
    (a multiple of the native sublane tile so every vreg is dense)."""
    return _round_up(max(1, -(-P // _LANE)), _sublane(compute_dtype))


def _pack_spatial(a, P, srpad, dtype):
    """a: (..., P) -> (..., srpad, 128), zero-padded and cast to `dtype`."""
    a = a.astype(dtype)
    pad = srpad * _LANE - P
    if pad:
        a = jnp.pad(a, [(0, 0)] * (a.ndim - 1) + [(0, pad)])
    return a.reshape(*a.shape[:-1], srpad, _LANE)


def pack_mul2d_weights(ws, compute_dtype=None):
    """ws: (S, Ci, Co, X, Y) f32 -> lane/sublane-dense (S, Ci, Co, srpad, 128)."""
    if compute_dtype is None:
        compute_dtype = _mul2d_compute_dtype()
    S, Ci, Co, X, Y = ws.shape
    P = X * Y
    srpad = _spatial_rows(P, compute_dtype)
    return _pack_spatial(ws.reshape(S, Ci, Co, P), P, srpad, compute_dtype)


def _choose_tiles(srpad, B, Ci, Co, compute_dtype, budget_bytes=24 * _MIB):
    """Pick (spatial-row tile, out-channel tile) so double-buffered blocks fit
    comfortably inside every generation's VMEM."""
    sub = _sublane(compute_dtype)
    isz = jnp.dtype(compute_dtype).itemsize

    def per_row_bytes(tco):
        # double-buffered x + w input blocks (compute dtype) and out block (f32)
        return 2 * _LANE * ((B * Ci + Ci * tco) * isz + B * tco * 4)

    for tco in [d for d in range(Co, 0, -1) if Co % d == 0]:
        pr = per_row_bytes(tco)
        ts, t = 0, sub
        while t <= srpad:
            if srpad % t == 0 and t * pr <= budget_bytes:
                ts = t
            t += sub
        if ts:
            return ts, tco
    # TODO(synk): extreme B*Ci configs would additionally need a batch tile axis.
    return sub, 1


def _vmem_limit_bytes(ts, tco, B, Ci, compute_dtype):
    """Explicit VMEM limit derived from the block sizes, capped per generation."""
    isz = jnp.dtype(compute_dtype).itemsize
    used = 2 * ts * _LANE * ((B * Ci + Ci * tco) * isz + B * tco * 4)
    cap = (56 if _is_v7x() else 100) * _MIB
    return int(min(cap, max(2 * used, 32 * _MIB)))


# ----------------------------------------------------------------------------
# Pallas kernel: fused channel mix over all 4 subbands
#   out[s, b, o, p] = sum_i x[s, i, b, p] * w[s, i, o, p]
# ----------------------------------------------------------------------------
def _mul2d_fused_kernel(x_ref, w_ref, o_ref):
    # x_ref: (1, Ci, B, TS, 128)   w_ref: (1, Ci, TCo, TS, 128)   o_ref: (1, B, TCo, TS, 128)
    ci = x_ref.shape[1]
    acc = jnp.zeros(o_ref.shape[1:], jnp.float32)
    # Accumulation loop over Ci: live set = one x slab + one w slab + acc.
    # Ci is static (block dim) -> fully unrolled, no (B, Ci, Co, P) intermediate.
    for i in range(ci):
        xi = x_ref[0, i]                           # (B,  TS, 128)  compute dtype
        wi = w_ref[0, i]                           # (TCo,TS, 128)  compute dtype
        # bf16 multiply on v6e/v7x (f32 on v5e), f32 accumulate.
        acc = acc + (xi[:, None] * wi[None, :]).astype(jnp.float32)
    o_ref[0] = acc.astype(o_ref.dtype)


def mul2d_fused_pallas(xs, ws, compute_dtype=None, ws_packed=None, out_dtype=jnp.float32):
    """xs: (S, B, Ci, X, Y), ws: (S, Ci, Co, X, Y) -> (S, B, Co, X, Y) in `out_dtype`."""
    S, B, Ci, X, Y = xs.shape
    Co = ws.shape[2]
    if ws.shape[-2:] != (X, Y):
        raise ValueError(f"spatial mismatch: x {(X, Y)} vs w {ws.shape[-2:]}")
    P = X * Y
    if compute_dtype is None:
        compute_dtype = _mul2d_compute_dtype()
    srpad = _spatial_rows(P, compute_dtype)

    # x laid out (S, Ci, B, srpad, 128): Ci leading so the kernel indexes it with
    # static ints; the (rows, 128) spatial tile is sublane/lane dense regardless
    # of how small B / Ci / Co are.  Single fused wrapper pass (transpose+cast+pad).
    xs_p = _pack_spatial(
        jnp.transpose(xs, (0, 2, 1, 3, 4)).reshape(S, Ci, B, P), P, srpad, compute_dtype)
    if (ws_packed is None or ws_packed.shape != (S, Ci, Co, srpad, _LANE)
            or ws_packed.dtype != jnp.dtype(compute_dtype)):
        ws_packed = pack_mul2d_weights(ws, compute_dtype)

    ts, tco = _choose_tiles(srpad, B, Ci, Co, compute_dtype)
    grid = (S, srpad // ts, Co // tco)

    out = pl.pallas_call(
        _mul2d_fused_kernel,
        out_shape=jax.ShapeDtypeStruct((S, B, Co, srpad, _LANE), out_dtype),
        grid_spec=pltpu.PrefetchScalarGridSpec(
            num_scalar_prefetch=0,
            grid=grid,
            in_specs=[
                # x block is constant across the out-channel axis (no re-DMA).
                pl.BlockSpec((1, Ci, B, ts, _LANE), lambda s, t, c: (s, 0, 0, t, 0)),
                pl.BlockSpec((1, Ci, tco, ts, _LANE), lambda s, t, c: (s, 0, c, t, 0)),
            ],
            out_specs=pl.BlockSpec((1, B, tco, ts, _LANE), lambda s, t, c: (s, 0, c, t, 0)),
        ),
        compiler_params=pltpu.CompilerParams(
            dimension_semantics=("parallel", "parallel", "parallel"),
            vmem_limit_bytes=_vmem_limit_bytes(ts, tco, B, Ci, compute_dtype),
        ),
    )(xs_p, ws_packed)

    out = out.reshape(S, B, Co, srpad * _LANE)[..., :P].reshape(S, B, Co, X, Y)
    return out


def mul2d_fused_ref(xs, ws, compute_dtype=None, ws_packed=None, out_dtype=jnp.float32):
    """Pure-JAX reference with the same multiply/accumulate rounding as the kernel."""
    del ws_packed
    if compute_dtype is None:
        compute_dtype = _mul2d_compute_dtype()
    xc = xs.astype(compute_dtype)                          # (S, B, Ci, X, Y)
    wc = ws.astype(compute_dtype)                          # (S, Ci, Co, X, Y)
    prod = (xc[:, :, :, None] * wc[:, None]).astype(jnp.float32)   # (S, B, Ci, Co, X, Y)
    return jnp.sum(prod, axis=2).astype(out_dtype)


# ----------------------------------------------------------------------------
# WaveConv2d module
# ----------------------------------------------------------------------------
class WaveConv2d:
    def __init__(self, key, in_channels, out_channels, level, shape):
        self.in_channels = in_channels
        self.out_channels = out_channels
        self.level = level
        self.shape = tuple(shape)
        self.filters = _wavelet_filters(jnp.float32)
        dec_lo, dec_hi, _, _ = self.filters

        # modes = spatial size of the level-J approximation coefficients
        # (mirrors the PyTorch module's dummy-data DWT, via shape-only evaluation).
        dummy = jax.ShapeDtypeStruct((1,) + self.shape + (in_channels,), jnp.float32)
        yl = jax.eval_shape(lambda d: dwt2d_nhwc(d, dec_lo, dec_hi, level)[0], dummy)
        self.modes1, self.modes2 = int(yl.shape[1]), int(yl.shape[2])

        scale = 1.0 / (in_channels * out_channels)
        wshape = (in_channels, out_channels, self.modes1, self.modes2)
        ks = jax.random.split(key, 4)
        self.weights1 = scale * jax.random.uniform(ks[0], wshape, jnp.float32)
        self.weights2 = scale * jax.random.uniform(ks[1], wshape, jnp.float32)
        self.weights3 = scale * jax.random.uniform(ks[2], wshape, jnp.float32)
        self.weights4 = scale * jax.random.uniform(ks[3], wshape, jnp.float32)

        # Cached packed weights: parameters, so the cast/pad/stack HBM pass is
        # paid once instead of every forward.  (Re-pack if weights are updated.)
        self.compute_dtype = _mul2d_compute_dtype()
        self._ws_stacked = jnp.stack(
            [self.weights1, self.weights2, self.weights3, self.weights4], axis=0)
        self._ws_packed = pack_mul2d_weights(self._ws_stacked, self.compute_dtype)

    def forward(self, x, mul2d_fused=None):
        if mul2d_fused is None:
            mul2d_fused = mul2d_fused_pallas
        dec_lo, dec_hi, rec_lo, rec_hi = self.filters
        input_shape = tuple(x.shape[-2:])
        if input_shape != self.shape:
            factor_w = int(math.log2(input_shape[-2] / self.shape[-2]))
            factor_h = int(math.log2(input_shape[-1] / self.shape[-1]))
            J = self.level + max(factor_w, factor_h)
        else:
            J = self.level

        # Channels-last for the filter banks; convert once at entry / exit.
        x_nhwc = jnp.transpose(x, (0, 2, 3, 1))
        x_ft, x_coeff = dwt2d_nhwc(x_nhwc, dec_lo, dec_hi, J)
        last = x_coeff[-1]                                   # (B, h, w, Ci, 3)

        # Single fused Pallas call for the approximation band + 3 coarsest details.
        xs = jnp.stack([x_ft, last[..., 0], last[..., 1], last[..., 2]], axis=0)
        xs = jnp.transpose(xs, (0, 1, 4, 2, 3))              # (4, B, Ci, h, w)
        ys = mul2d_fused(xs, self._ws_stacked,
                         compute_dtype=self.compute_dtype,
                         ws_packed=self._ws_packed)          # (4, B, Co, h, w) f32

        ys_nhwc = jnp.transpose(ys, (0, 1, 3, 4, 2))          # (4, B, h, w, Co)
        out_ft = ys_nhwc[0]
        new_last = jnp.stack([ys_nhwc[1], ys_nhwc[2], ys_nhwc[3]], axis=-1)
        x_coeff = x_coeff[:-1] + [new_last]

        out_nhwc = idwt2d_nhwc(out_ft, x_coeff, rec_lo, rec_hi)
        return jnp.transpose(out_nhwc, (0, 3, 1, 2))


# ----------------------------------------------------------------------------
if __name__ == "__main__":
    key = jax.random.PRNGKey(0)
    k_x, k_w = jax.random.split(key)

    B, C, H, W = 2, 4, 16, 16
    model = WaveConv2d(k_w, in_channels=C, out_channels=C, level=2, shape=(H, W))
    x = jax.random.normal(k_x, (B, C, H, W), jnp.float32)

    fwd_pallas = jax.jit(lambda xx: model.forward(xx, mul2d_fused=mul2d_fused_pallas))
    out = jax.block_until_ready(fwd_pallas(x))
    assert out.shape == (B, C, H, W), out.shape

    # 1) End-to-end: Pallas hot path vs pure-JAX reference with identical rounding.
    fwd_ref = jax.jit(lambda xx: model.forward(xx, mul2d_fused=mul2d_fused_ref))
    ref = jax.block_until_ready(fwd_ref(x))
    assert jnp.allclose(out, ref, atol=1e-3, rtol=1e-3), "Pallas mul2d mismatch (e2e)"

    # 2) Kernel alone in forced f32 vs f32 einsum (tight, chip-independent check).
    xs_t = jax.random.normal(jax.random.PRNGKey(1), (4, B, C, 7, 9), jnp.float32)
    ws_t = jax.random.normal(jax.random.PRNGKey(2), (4, C, C, 7, 9), jnp.float32)
    y_pl = jax.block_until_ready(jax.jit(
        lambda a, b: mul2d_fused_pallas(a, b, compute_dtype=jnp.float32))(xs_t, ws_t))
    y_rf = jnp.einsum("sbixy,sioxy->sboxy", xs_t, ws_t, precision=lax.Precision.HIGHEST)
    assert jnp.allclose(y_pl, y_rf, atol=1e-5, rtol=1e-5), "Pallas mul2d mismatch (f32)"

    # 3) Filter-bank self-check: db4 / symmetric DWT->IDWT is perfect reconstruction.
    dec_lo, dec_hi, rec_lo, rec_hi = model.filters
    recon = jax.block_until_ready(jax.jit(
        lambda xx: jnp.transpose(
            idwt2d_nhwc(*dwt2d_nhwc(jnp.transpose(xx, (0, 2, 3, 1)),
                                    dec_lo, dec_hi, model.level),
                        rec_lo, rec_hi),
            (0, 3, 1, 2)))(x))
    assert jnp.allclose(recon, x, atol=1e-3, rtol=1e-3), "DWT/IDWT reconstruction error"

    print("KERNEL_OK")
</pallas_src>

<mosaic_0001>
module attributes {stable_mosaic.version = 11 : i64} {
  func.func @_mul2d_fused_kernel(%arg0: i32, %arg1: i32, %arg2: i32, %arg3: memref<1x4x2x8x128xf32, #tpu.memory_space<vmem>>, %arg4: memref<1x4x4x8x128xf32, #tpu.memory_space<vmem>>, %arg5: memref<1x2x4x8x128xf32, #tpu.memory_space<vmem>>) attributes {dimension_semantics = [#tpu.dimension_semantics<parallel>, #tpu.dimension_semantics<parallel>, #tpu.dimension_semantics<parallel>], iteration_bounds = array<i64: 4, 1, 1>, scalar_prefetch = 0 : i64, scratch_operands = 0 : i64, tpu.core_type = #tpu.core_type<tc>, window_params = [{transform_indices = @transform_0, window_bounds = array<i64: 1, 4, 2, 8, 128>}, {transform_indices = @transform_1, window_bounds = array<i64: 1, 4, 4, 8, 128>}, {transform_indices = @transform_2, window_bounds = array<i64: 1, 2, 4, 8, 128>}]} {
    %cst = arith.constant 0.000000e+00 : f32
    %0 = vector.broadcast %cst : f32 to vector<2x4x8x128xf32>
    %c0 = arith.constant 0 : index
    %c0_0 = arith.constant 0 : index
    %c0_1 = arith.constant 0 : index
    %c0_2 = arith.constant 0 : index
    %c0_3 = arith.constant 0 : index
    %1 = vector.load %arg3[%c0, %c0_0, %c0_1, %c0_2, %c0_3] : memref<1x4x2x8x128xf32, #tpu.memory_space<vmem>>, vector<1x1x2x8x128xf32>
    %2 = vector.shape_cast %1 : vector<1x1x2x8x128xf32> to vector<2x8x128xf32>
    %c0_4 = arith.constant 0 : index
    %c0_5 = arith.constant 0 : index
    %c0_6 = arith.constant 0 : index
    %c0_7 = arith.constant 0 : index
    %c0_8 = arith.constant 0 : index
    %3 = vector.load %arg4[%c0_4, %c0_5, %c0_6, %c0_7, %c0_8] : memref<1x4x4x8x128xf32, #tpu.memory_space<vmem>>, vector<1x1x4x8x128xf32>
    %4 = vector.shape_cast %3 : vector<1x1x4x8x128xf32> to vector<4x8x128xf32>
    %5 = vector.shape_cast %2 : vector<2x8x128xf32> to vector<2x1x8x128xf32>
    %6 = vector.shape_cast %4 : vector<4x8x128xf32> to vector<1x4x8x128xf32>
    %7 = vector.broadcast %5 : vector<2x1x8x128xf32> to vector<2x4x8x128xf32>
    %8 = vector.broadcast %6 : vector<1x4x8x128xf32> to vector<2x4x8x128xf32>
    %9 = arith.mulf %7, %8 : vector<2x4x8x128xf32>
    %10 = arith.addf %0, %9 : vector<2x4x8x128xf32>
    %c0_9 = arith.constant 0 : index
    %c1 = arith.constant 1 : index
    %c0_10 = arith.constant 0 : index
    %c0_11 = arith.constant 0 : index
    %c0_12 = arith.constant 0 : index
    %11 = vector.load %arg3[%c0_9, %c1, %c0_10, %c0_11, %c0_12] : memref<1x4x2x8x128xf32, #tpu.memory_space<vmem>>, vector<1x1x2x8x128xf32>
    %12 = vector.shape_cast %11 : vector<1x1x2x8x128xf32> to vector<2x8x128xf32>
    %c0_13 = arith.constant 0 : index
    %c1_14 = arith.constant 1 : index
    %c0_15 = arith.constant 0 : index
    %c0_16 = arith.constant 0 : index
    %c0_17 = arith.constant 0 : index
    %13 = vector.load %arg4[%c0_13, %c1_14, %c0_15, %c0_16, %c0_17] : memref<1x4x4x8x128xf32, #tpu.memory_space<vmem>>, vector<1x1x4x8x128xf32>
    %14 = vector.shape_cast %13 : vector<1x1x4x8x128xf32> to vector<4x8x128xf32>
    %15 = vector.shape_cast %12 : vector<2x8x128xf32> to vector<2x1x8x128xf32>
    %16 = vector.shape_cast %14 : vector<4x8x128xf32> to vector<1x4x8x128xf32>
    %17 = vector.broadcast %15 : vector<2x1x8x128xf32> to vector<2x4x8x128xf32>
    %18 = vector.broadcast %16 : vector<1x4x8x128xf32> to vector<2x4x8x128xf32>
    %19 = arith.mulf %17, %18 : vector<2x4x8x128xf32>
    %20 = arith.addf %10, %19 : vector<2x4x8x128xf32>
    %c0_18 = arith.constant 0 : index
    %c2 = arith.constant 2 : index
    %c0_19 = arith.constant 0 : index
    %c0_20 = arith.constant 0 : index
    %c0_21 = arith.constant 0 : index
    %21 = vector.load %arg3[%c0_18, %c2, %c0_19, %c0_20, %c0_21] : memref<1x4x2x8x128xf32, #tpu.memory_space<vmem>>, vector<1x1x2x8x128xf32>
    %22 = vector.shape_cast %21 : vector<1x1x2x8x128xf32> to vector<2x8x128xf32>
    %c0_22 = arith.constant 0 : index
    %c2_23 = arith.constant 2 : index
    %c0_24 = arith.constant 0 : index
    %c0_25 = arith.constant 0 : index
    %c0_26 = arith.constant 0 : index
    %23 = vector.load %arg4[%c0_22, %c2_23, %c0_24, %c0_25, %c0_26] : memref<1x4x4x8x128xf32, #tpu.memory_space<vmem>>, vector<1x1x4x8x128xf32>
    %24 = vector.shape_cast %23 : vector<1x1x4x8x128xf32> to vector<4x8x128xf32>
    %25 = vector.shape_cast %22 : vector<2x8x128xf32> to vector<2x1x8x128xf32>
    %26 = vector.shape_cast %24 : vector<4x8x128xf32> to vector<1x4x8x128xf32>
    %27 = vector.broadcast %25 : vector<2x1x8x128xf32> to vector<2x4x8x128xf32>
    %28 = vector.broadcast %26 : vector<1x4x8x128xf32> to vector<2x4x8x128xf32>
    %29 = arith.mulf %27, %28 : vector<2x4x8x128xf32>
    %30 = arith.addf %20, %29 : vector<2x4x8x128xf32>
    %c0_27 = arith.constant 0 : index
    %c3 = arith.constant 3 : index
    %c0_28 = arith.constant 0 : index
    %c0_29 = arith.constant 0 : index
    %c0_30 = arith.constant 0 : index
    %31 = vector.load %arg3[%c0_27, %c3, %c0_28, %c0_29, %c0_30] : memref<1x4x2x8x128xf32, #tpu.memory_space<vmem>>, vector<1x1x2x8x128xf32>
    %32 = vector.shape_cast %31 : vector<1x1x2x8x128xf32> to vector<2x8x128xf32>
    %c0_31 = arith.constant 0 : index
    %c3_32 = arith.constant 3 : index
    %c0_33 = arith.constant 0 : index
    %c0_34 = arith.constant 0 : index
    %c0_35 = arith.constant 0 : index
    %33 = vector.load %arg4[%c0_31, %c3_32, %c0_33, %c0_34, %c0_35] : memref<1x4x4x8x128xf32, #tpu.memory_space<vmem>>, vector<1x1x4x8x128xf32>
    %34 = vector.shape_cast %33 : vector<1x1x4x8x128xf32> to vector<4x8x128xf32>
    %35 = vector.shape_cast %32 : vector<2x8x128xf32> to vector<2x1x8x128xf32>
    %36 = vector.shape_cast %34 : vector<4x8x128xf32> to vector<1x4x8x128xf32>
    %37 = vector.broadcast %35 : vector<2x1x8x128xf32> to vector<2x4x8x128xf32>
    %38 = vector.broadcast %36 : vector<1x4x8x128xf32> to vector<2x4x8x128xf32>
    %39 = arith.mulf %37, %38 : vector<2x4x8x128xf32>
    %40 = arith.addf %30, %39 : vector<2x4x8x128xf32>
    %c0_36 = arith.constant 0 : index
    %c0_37 = arith.constant 0 : index
    %c0_38 = arith.constant 0 : index
    %c0_39 = arith.constant 0 : index
    %c0_40 = arith.constant 0 : index
    %41 = vector.load %arg5[%c0_36, %c0_37, %c0_38, %c0_39, %c0_40] : memref<1x2x4x8x128xf32, #tpu.memory_space<vmem>>, vector<1x2x4x8x128xf32>
    %42 = vector.shape_cast %41 : vector<1x2x4x8x128xf32> to vector<2x4x8x128xf32>
    %43 = vector.shape_cast %40 : vector<2x4x8x128xf32> to vector<1x2x4x8x128xf32>
    tpu.vector_store %arg5[%c0_36, %c0_37, %c0_38, %c0_39, %c0_40], %43 {strides = array<i32>} : memref<1x2x4x8x128xf32, #tpu.memory_space<vmem>>, vector<1x2x4x8x128xf32>,
    return
  }
  func.func @transform_0(%arg0: i32, %arg1: i32, %arg2: i32) -> (i32, i32, i32, i32, i32) {
    %c0_i32 = arith.constant 0 : i32
    %c0_i32_0 = arith.constant 0 : i32
    %c0_i32_1 = arith.constant 0 : i32
    %c0_i32_2 = arith.constant 0 : i32
    return %arg0, %c0_i32, %c0_i32_0, %arg1, %c0_i32_1 : i32, i32, i32, i32, i32
  }
  func.func @transform_1(%arg0: i32, %arg1: i32, %arg2: i32) -> (i32, i32, i32, i32, i32) {
    %c0_i32 = arith.constant 0 : i32
    %c0_i32_0 = arith.constant 0 : i32
    %c0_i32_1 = arith.constant 0 : i32
    return %arg0, %c0_i32, %arg2, %arg1, %c0_i32_0 : i32, i32, i32, i32, i32
  }
  func.func @transform_2(%arg0: i32, %arg1: i32, %arg2: i32) -> (i32, i32, i32, i32, i32) {
    %c0_i32 = arith.constant 0 : i32
    %c0_i32_0 = arith.constant 0 : i32
    %c0_i32_1 = arith.constant 0 : i32
    return %arg0, %c0_i32, %arg2, %arg1, %c0_i32_0 : i32, i32, i32, i32, i32
  }
}

</mosaic_0001>

<bundles_post_ra>
// kernel: _lambda_.1
= control target key start
LH: loop header
LB: loop body
LE: loop exit
PB: predicated region body
PF: predicated region fallthrough
CT: control target
= control target key end

     0   :  { %s560_s9 = smov 0   ;;  %s562_s10 = smov 0   ;;  %s642_s0 = inlined_call_operand.vmem [shape: f32[4,4,2,8,128], index: 0, kind: input, shape index: {}]   ;;  %s643_s1 = inlined_call_operand.vmem [shape: f32[4,4,4,8,128], index: 1, kind: input, shape index: {}]   ;;  %s644_s2 = inlined_call_operand.vmem [shape: f32[4,2,4,8,128], index: 2, kind: output, shape index: {}]  }
   0x1   :  { %s564_s11 = smov 0  }
   0x2 LB: > { %s31_s12 = sadd.s32 1, %s539_s10  ;;  %p467_p0 = scmp.ge.s32.totalorder %s543_s11, 1  ;;  %s543_s11 = sphi %s564_s11, %s12_s11   ;;  %s539_s10 = sphi %s562_s10, %s646_s10   ;;  %s535_s9 = sphi %s560_s9, %s645_s9  }
   0x3   : > { %p33_p1 = scmp.ge.s32.totalorder %s31_s12, 4  ;;  %p162_p2 = scmp.lt.s32.totalorder %s543_s11, 5 }
   0x5   : > { %s648_s12 = smov (%p33_p1, %s31_s12), 0  ;;  %p163_p3 = pnand %p467_p0, %p162_p2 }
   0x6   : > { %p206_p4 = scmp.lt.s32.totalorder (!%p163_p3), %s535_s9, 3 }
   0x7   : > { %166 = sbr.rel (%p163_p3) target bundleno = 40 (0x28), region = 28 }
   0xe   : > { %s650_s9 = smov (!%p206_p4, %s535_s9), 3 }
   0xf   : > { %s494_s13 = sshll.u32 %s650_s9, 6  ;;  %s495_s14 = sshll.u32 %s650_s9, 7 }
  0x10   : > { %s587_s17 = scalar_lea.vmem %s642_s0, %s494_s13  ;;  %s592_s20 = scalar_lea.vmem %s643_s1, %s495_s14 }
  0x11   : > { %v240_v0 = vld [vmem:[%s587_s17] sm:$0xff]  ;;  %v474_v2 = vld [vmem:[%s587_s17 + $0x10] sm:$0xff]  ;;  %v243_v11 = vld [vmem:[%s592_s20 + $0x8] sm:$0xff]  ;;  %s620_s23 = scalar_lea.vmem %s644_s2, %s494_s13 }
  0x12   : > { %v242_v1 = vld [vmem:[%s592_s20] sm:$0xff]  ;;  %v486_v9 = vld [vmem:[%s587_s17 + $0x30] sm:$0xff]  ;;  %v247_v12 = vmul.f32 %v243_v11, %v240_v0  ;;  %v477_v13 = vld [vmem:[%s592_s20 + $0x28] sm:$0xff] }
  0x13   : > { %v246_v3 = vmul.f32 %v242_v1, %v240_v0  ;;  %v476_v4 = vld [vmem:[%s592_s20 + $0x20] sm:$0xff]  ;;  %v483_v14 = vld [vmem:[%s592_s20 + $0x48] sm:$0xff]  ;;  %v271_v18 = vmul.f32 %v477_v13, %v474_v2  ;;  %v244_v20 = vld [vmem:[%s592_s20 + $0x10] sm:$0xff] }
  0x14   : > { %v480_v5 = vld [vmem:[%s587_s17 + $0x20] sm:$0xff]  ;;  %v270_v7 = vmul.f32 %v476_v4, %v474_v2  ;;  %v489_v15 = vld [vmem:[%s592_s20 + $0x68] sm:$0xff]  ;;  %v478_v21 = vld [vmem:[%s592_s20 + $0x30] sm:$0xff]  ;;  %v248_v24 = vmul.f32 %v244_v20, %v240_v0 }
  0x15   : > { %v482_v6 = vld [vmem:[%s592_s20 + $0x40] sm:$0xff]  ;;  %v295_v19 = vmul.f32 %v483_v14, %v480_v5  ;;  %v484_v22 = vld [vmem:[%s592_s20 + $0x50] sm:$0xff]  ;;  %v319_v23 = vmul.f32 %v489_v15, %v486_v9  ;;  %v272_v25 = vmul.f32 %v478_v21, %v474_v2  ;;  %v245_v28 = vld [vmem:[%s592_s20 + $0x18] sm:$0xff]  ;;  %v279_v31 = vadd.f32 %v271_v18, %v247_v12 }
  0x16   : > { %v294_v8 = vmul.f32 %v482_v6, %v480_v5  ;;  %v488_v10 = vld [vmem:[%s592_s20 + $0x60] sm:$0xff]  ;;  %v278_v16 = vadd.f32 %v270_v7, %v246_v3  ;;  %v296_v26 = vmul.f32 %v484_v22, %v480_v5  ;;  %v490_v27 = vld [vmem:[%s592_s20 + $0x70] sm:$0xff]  ;;  %v479_v29 = vld [vmem:[%s592_s20 + $0x38] sm:$0xff]  ;;  %v249_v33 = vmul.f32 %v245_v28, %v240_v0 }
  0x17   : > { %v318_v17 = vmul.f32 %v488_v10, %v486_v9  ;;  %v320_v32 = vmul.f32 %v490_v27, %v486_v9  ;;  %v485_v34 = vld [vmem:[%s592_s20 + $0x58] sm:$0xff]  ;;  %v241_v36 = vld [vmem:[%s587_s17 + $0x8] sm:$0xff]  ;;  %v280_v37 = vadd.f32 %v272_v25, %v248_v24  ;;  %v273_v38 = vmul.f32 %v479_v29, %v474_v2 }
  0x18   : > { %v302_v30 = vadd.f32 %v294_v8, %v278_v16  ;;  %v491_v35 = vld [vmem:[%s592_s20 + $0x78] sm:$0xff]  ;;  %v297_v39 = vmul.f32 %v485_v34, %v480_v5  ;;  %v481_v42 = vld [vmem:[%s587_s17 + $0x28] sm:$0xff]  ;;  %v303_v45 = vadd.f32 %v295_v19, %v279_v31  ;;  %v250_v46 = vmul.f32 %v242_v1, %v241_v36 }
  0x19   : > { %v321_v40 = vmul.f32 %v491_v35, %v486_v9  ;;  %v475_v41 = vld [vmem:[%s587_s17 + $0x18] sm:$0xff]  ;;  %v304_v48 = vadd.f32 %v296_v26, %v280_v37  ;;  %v281_v49 = vadd.f32 %v273_v38, %v249_v33  ;;  %v298_v50 = vmul.f32 %v482_v6, %v481_v42 }
  0x1a   : > { %v487_v43 = vld [vmem:[%s587_s17 + $0x38] sm:$0xff]  ;;  %v326_v44 = vadd.f32 %v318_v17, %v302_v30  ;;  %v274_v47 = vmul.f32 %v476_v4, %v475_v41  ;;  %v327_v52 = vadd.f32 %v319_v23, %v303_v45  ;;  %v251_v54 = vmul.f32 %v243_v11, %v241_v36 }
  0x1b   : > { %v322_v51 = vmul.f32 %v488_v10, %v487_v43  ;;  %v275_v55 = vmul.f32 %v477_v13, %v475_v41  ;;  %v328_v56 = vadd.f32 %v320_v32, %v304_v48  ;;  %v305_v57 = vadd.f32 %v297_v39, %v281_v49 }
  0x1c   : > { %334 = vst [vmem:[%s620_s23] sm:$0xff] %v326_v44  ;;  %v282_v53 = vadd.f32 %v274_v47, %v250_v46  ;;  %v299_v58 = vmul.f32 %v483_v14, %v481_v42  ;;  %v323_v59 = vmul.f32 %v489_v15, %v487_v43  ;;  %335 = vst [vmem:[%s620_s23 + $0x8] sm:$0xff] %v327_v52 }
  0x1d   : > { %v283_v61 = vadd.f32 %v275_v55, %v251_v54  ;;  %v252_v62 = vmul.f32 %v244_v20, %v241_v36  ;;  %v276_v63 = vmul.f32 %v478_v21, %v475_v41  ;;  %336 = vst [vmem:[%s620_s23 + $0x10] sm:$0xff] %v328_v56  ;;  %v329_v0 = vadd.f32 %v321_v40, %v305_v57 }
  0x1e   : > { %v306_v60 = vadd.f32 %v298_v50, %v282_v53  ;;  %v300_v1 = vmul.f32 %v484_v22, %v481_v42  ;;  %v324_v2 = vmul.f32 %v490_v27, %v487_v43  ;;  %v253_v3 = vmul.f32 %v245_v28, %v241_v36 }
  0x1f   : > { %v307_v5 = vadd.f32 %v299_v58, %v283_v61  ;;  %v284_v6 = vadd.f32 %v276_v63, %v252_v62  ;;  %v277_v7 = vmul.f32 %v479_v29, %v475_v41  ;;  %337 = vst [vmem:[%s620_s23 + $0x18] sm:$0xff] %v329_v0  ;;  %v301_v8 = vmul.f32 %v485_v34, %v481_v42 }
  0x20   : > { %v330_v4 = vadd.f32 %v322_v51, %v306_v60  ;;  %v325_v12 = vmul.f32 %v491_v35, %v487_v43 }
  0x21   : > { %v331_v9 = vadd.f32 %v323_v59, %v307_v5  ;;  %v308_v10 = vadd.f32 %v300_v1, %v284_v6  ;;  %v285_v11 = vadd.f32 %v277_v7, %v253_v3 }
  0x22   : > { %338 = vst [vmem:[%s620_s23 + $0x20] sm:$0xff] %v330_v4 }
  0x23   : > { %339 = vst [vmem:[%s620_s23 + $0x28] sm:$0xff] %v331_v9  ;;  %v332_v13 = vadd.f32 %v324_v2, %v308_v10  ;;  %v309_v14 = vadd.f32 %v301_v8, %v285_v11 }
  0x25   : > { %340 = vst [vmem:[%s620_s23 + $0x30] sm:$0xff] %v332_v13  ;;  %v333_v15 = vadd.f32 %v325_v12, %v309_v14 }
  0x27   : > { %341 = vst [vmem:[%s620_s23 + $0x38] sm:$0xff] %v333_v15 }
  0x28 PF: > { %s12_s11 = sadd.s32 1, %s543_s11   ;;  %s645_s9 = smov %s539_s10 }
  0x29   : > { %p9_p5 = scmp.ge.s32.totalorder %s12_s11, 6   ;;  %s646_s10 = smov %s648_s12 }
  0x2b   :  { %11 = sbr.rel (!%p9_p5) target bundleno = 2 (0x2), region = 67 }

</bundles_post_ra>
